<compile_context>
chip_gen: v5e
topology: v5e:2x2
jax: 0.10.0
libtpu: 0.0.40
codegen_flags: <defaults>
</compile_context>

<pallas_src>
import jax
import jax.numpy as jnp
from jax.experimental import pallas as pl
from jax.experimental.pallas import tpu as pltpu

# ---------------- configuration (small, consistent with the module) ----------
B = 8                 # batch (>=8 rows per call so the fc matmuls see M=8, not 2)
NUM_FRAMES = 2        # cfg['num_frames']  -> in_chans = 3 * num_frames = 6
C = 3 * NUM_FRAMES
H = W = 16            # spatial (small synthetic stand-in for >=224)
P = 4                 # patch size of the encoder stand-in
NP = (H // P) * (W // P)          # patches per image = 16
PATCH_DIM = C * P * P             # 96 (no explicit 128-pad; Mosaic pads K)
FEAT = 128            # cfg['timm_feat_size']
FC = 128              # cfg['fc_size']
OUT = 8               # cfg['output_size']  (must be even; reshaped to (B, OUT//2, 2))
OUT_PAD = 128         # lane-dense output slab; sliced back to OUT in the wrapper
BN_EPS = 1e-5
LEAKY_SLOPE = 0.01    # F.leaky_relu default


def e2e_kernel(patches_ref, wp_ref, w_ref, bias_ref, o_ref):
    # ---- timm encoder stand-in: patch embed (bf16 MXU, f32 acc) + ReLU ------
    # TODO(synk): pretrained timm backbone has no Pallas equivalent; replaced
    # by a deterministic patch-embed + ReLU + global-average-pool encoder.
    h = jnp.dot(patches_ref[...], wp_ref[...],
                preferred_element_type=jnp.float32)            # (B*NP, FEAT) f32
    h = jnp.maximum(h, 0.0)

    # ---- global average pool over patches ------------------------------------
    # 1/NP is pre-folded into w_patch, so the pool is a sublane-axis sum on the
    # XLU (which has slack); kept OFF the MXU on purpose.
    feat = jnp.sum(h.reshape(B, NP, FEAT), axis=1)             # (B, FEAT) f32

    biases = bias_ref[...]                                     # (2, 128) f32
    w_fc = w_ref[:FEAT, :]                                     # (128, 128) bf16
    w_out = w_ref[FEAT:, :]                                    # (128, 128) bf16

    # ---- fc (no bias) with eval-mode BatchNorm1d folded into weights + bias --
    # bf16 operands -> single-pass MXU; accumulate / bias add stay f32.
    z = jnp.dot(feat.astype(jnp.bfloat16), w_fc,
                preferred_element_type=jnp.float32)            # (B, FC) f32
    z = z + biases[0:1, :]

    # ---- leaky_relu (f32) -----------------------------------------------------
    z = jnp.where(z >= 0.0, z, LEAKY_SLOPE * z)

    # ---- dropout: identity in inference mode ----------------------------------

    # ---- fc_out (OUT zero-padded to 128 lanes -> unmasked lane-dense store) ---
    y = jnp.dot(z.astype(jnp.bfloat16), w_out,
                preferred_element_type=jnp.float32)            # (B, OUT_PAD) f32
    o_ref[...] = y + biases[1:2, :]


def fold_params(params):
    """One-time folding of BN / pool scale / padding into bf16 MXU weights."""
    # BN (eval): y = (x - mean) * gamma / sqrt(var+eps) + beta  folded into fc.
    scale = params["bn_gamma"] * jax.lax.rsqrt(params["bn_var"] + BN_EPS)   # (1, FC)
    w_fc_fused = (params["w_fc"] * scale).astype(jnp.bfloat16)              # (FEAT, FC)
    b_fc_fused = params["bn_beta"] - params["bn_mean"] * scale              # (1, FC) f32

    # Patch embed: fold 1/NP (exact: power of two) under ReLU homogeneity; keep
    # the contraction dim at its natural 96 (no explicit pad), bf16 for the MXU.
    w_patch = (params["w_patch"] * (1.0 / NP)).astype(jnp.bfloat16)         # (96, FEAT)

    # Output head: pad OUT 8 -> 128 lanes; stack fc + fc_out weights into one
    # bf16 slab so the kernel has a single small-weight operand.
    w_out = jnp.pad(params["w_out"], ((0, 0), (0, OUT_PAD - OUT))).astype(jnp.bfloat16)
    b_out = jnp.pad(params["b_out"], ((0, 0), (0, OUT_PAD - OUT)))          # (1, 128) f32

    w_stack = jnp.concatenate([w_fc_fused, w_out], axis=0)                  # (256, 128) bf16
    biases = jnp.concatenate([b_fc_fused, b_out], axis=0)                   # (2, 128) f32

    return {"w_patch": w_patch, "w_stack": w_stack, "biases": biases}


def e2e_forward(x, fused):
    """x: (B, C, H, W) float32, NCHW like PyTorch. Returns (B, OUT//2, 2)."""
    b, c, h, w = x.shape
    # glue: NCHW -> (B*NP, PATCH_DIM) patch unfold + bf16 cast (one XLA fusion
    # under jit, feeding the pallas_call directly).
    patches = (x.reshape(b, c, h // P, P, w // P, P)
                 .transpose(0, 2, 4, 1, 3, 5)
                 .reshape(b * NP, PATCH_DIM)
                 .astype(jnp.bfloat16))

    vmem = pl.BlockSpec(memory_space=pltpu.MemorySpace.VMEM)

    flops = (2 * (b * NP) * PATCH_DIM * FEAT    # patch embed
             + 2 * b * FEAT * FC                # fc (BN folded)
             + 2 * b * FC * OUT_PAD)            # fc_out
    bytes_accessed = ((b * NP) * PATCH_DIM * 2   # patches bf16
                      + PATCH_DIM * FEAT * 2     # w_patch bf16
                      + (FEAT + FC) * OUT_PAD * 2  # stacked fc/out weights bf16
                      + 2 * OUT_PAD * 4          # biases f32
                      + b * OUT_PAD * 4)         # output f32

    out = pl.pallas_call(
        e2e_kernel,
        out_shape=jax.ShapeDtypeStruct((b, OUT_PAD), jnp.float32),
        in_specs=[vmem] * 4,
        out_specs=vmem,
        cost_estimate=pl.CostEstimate(flops=flops, transcendentals=0,
                                      bytes_accessed=bytes_accessed),
    )(patches, fused["w_patch"], fused["w_stack"], fused["biases"])

    # glue: drop lane padding, then X.view(X.shape[0], -1, 2)
    return out[:, :OUT].reshape(b, -1, 2)


def e2e_reference(x, params):
    """Pure-JAX f32 reference with the module's original op ordering."""
    b, c, h, w = x.shape
    patches = (x.reshape(b, c, h // P, P, w // P, P)
                 .transpose(0, 2, 4, 1, 3, 5)
                 .reshape(b, NP, PATCH_DIM))
    emb = jnp.maximum(jnp.einsum("bpk,kf->bpf", patches, params["w_patch"]), 0.0)
    feat = jnp.mean(emb, axis=1)                                  # encoder output
    z = feat @ params["w_fc"]                                     # fc (no bias)
    scale = params["bn_gamma"] * jax.lax.rsqrt(params["bn_var"] + BN_EPS)
    z = (z - params["bn_mean"]) * scale + params["bn_beta"]       # BN (eval)
    z = jnp.where(z >= 0.0, z, LEAKY_SLOPE * z)                   # leaky_relu
    y = z @ params["w_out"] + params["b_out"]                     # fc_out
    return y.reshape(b, -1, 2)


def init_params(key):
    ks = jax.random.split(key, 8)
    params = {
        # encoder stand-in patch embedding (PATCH_DIM, FEAT)
        "w_patch": jax.random.normal(ks[0], (PATCH_DIM, FEAT), jnp.float32) * 0.05,
        # nn.Linear(FEAT, FC, bias=False): torch weight is (FC, FEAT); store transposed
        "w_fc": jax.random.normal(ks[1], (FEAT, FC), jnp.float32) * 0.05,
        # BatchNorm1d(FC) params / running stats, kept 2D (1, FC) for TPU layout
        "bn_gamma": jax.random.normal(ks[2], (1, FC), jnp.float32) * 0.1 + 1.0,
        "bn_beta": jax.random.normal(ks[3], (1, FC), jnp.float32) * 0.1,
        "bn_mean": jax.random.normal(ks[4], (1, FC), jnp.float32) * 0.1,
        "bn_var": jax.nn.softplus(jax.random.normal(ks[5], (1, FC), jnp.float32)) + 0.5,
        # nn.Linear(FC, OUT): torch weight (OUT, FC) stored transposed, bias (OUT,)
        "w_out": jax.random.normal(ks[6], (FC, OUT), jnp.float32) * 0.05,
        "b_out": jax.random.normal(ks[7], (1, OUT), jnp.float32) * 0.05,
    }
    return params


if __name__ == "__main__":
    key = jax.random.PRNGKey(0)
    k_x, k_p = jax.random.split(key)
    # images scaled/normalized upstream; synthetic normalized-ish input
    x = jax.random.normal(k_x, (B, C, H, W), jnp.float32)
    params = init_params(k_p)
    fused = fold_params(params)

    fwd = jax.jit(e2e_forward)          # fuse the patch-unfold / bf16 glue
    y = jax.block_until_ready(fwd(x, fused))
    assert y.shape == (B, OUT // 2, 2), y.shape

    # correctness vs f32 reference (bf16 MXU operands -> ~1e-3 abs deviation)
    ref = e2e_reference(x, params)
    assert bool(jnp.allclose(y, ref, rtol=3e-2, atol=3e-2)), "mismatch vs reference"

    print("KERNEL_OK")
</pallas_src>

<mosaic_0001>
module attributes {stable_mosaic.version = 11 : i64} {
  func.func @e2e_kernel(%arg0: memref<128x96xbf16, #tpu.memory_space<vmem>>, %arg1: memref<96x128xbf16, #tpu.memory_space<vmem>>, %arg2: memref<256x128xbf16, #tpu.memory_space<vmem>>, %arg3: memref<2x128xf32, #tpu.memory_space<vmem>>, %arg4: memref<8x128xf32, #tpu.memory_space<vmem>>) attributes {dimension_semantics = [], scalar_prefetch = 0 : i64, scratch_operands = 0 : i64, tpu.core_type = #tpu.core_type<tc>} {
    %c0 = arith.constant 0 : index
    %c0_0 = arith.constant 0 : index
    %0 = vector.load %arg0[%c0, %c0_0] : memref<128x96xbf16, #tpu.memory_space<vmem>>, vector<128x96xbf16>
    %c0_1 = arith.constant 0 : index
    %c0_2 = arith.constant 0 : index
    %1 = vector.load %arg1[%c0_1, %c0_2] : memref<96x128xbf16, #tpu.memory_space<vmem>>, vector<96x128xbf16>
    %cst = arith.constant dense<0.000000e+00> : vector<128x128xf32>
    %2 = tpu.matmul %0, %1, %cst {dimension_numbers = #tpu.dot_dimension_numbers<[1], [0], [0], [1], [0, 0, 1, 1], [], []>} : vector<128x96xbf16>, vector<96x128xbf16>, vector<128x128xf32> -> vector<128x128xf32>
    %cst_3 = arith.constant 0.000000e+00 : f32
    %3 = vector.broadcast %cst_3 : f32 to vector<128x128xf32>
    %4 = arith.maximumf %2, %3 : vector<128x128xf32>
    %5 = vector.shape_cast %4 : vector<128x128xf32> to vector<8x16x128xf32>
    %cst_4 = arith.constant dense<0.000000e+00> : vector<8x128xf32>
    %6 = vector.multi_reduction <add>, %5, %cst_4 [1] : vector<8x16x128xf32> to vector<8x128xf32>
    %c0_5 = arith.constant 0 : index
    %c0_6 = arith.constant 0 : index
    %7 = vector.load %arg3[%c0_5, %c0_6] : memref<2x128xf32, #tpu.memory_space<vmem>>, vector<2x128xf32>
    %c0_7 = arith.constant 0 : index
    %c0_8 = arith.constant 0 : index
    %8 = vector.load %arg2[%c0_7, %c0_8] : memref<256x128xbf16, #tpu.memory_space<vmem>>, vector<128x128xbf16>
    %c128 = arith.constant 128 : index
    %c0_9 = arith.constant 0 : index
    %9 = vector.load %arg2[%c128, %c0_9] : memref<256x128xbf16, #tpu.memory_space<vmem>>, vector<128x128xbf16>
    %10 = arith.truncf %6 : vector<8x128xf32> to vector<8x128xbf16>
    %cst_10 = arith.constant dense<0.000000e+00> : vector<8x128xf32>
    %11 = tpu.matmul %10, %8, %cst_10 {dimension_numbers = #tpu.dot_dimension_numbers<[1], [0], [0], [1], [0, 0, 1, 1], [], []>} : vector<8x128xbf16>, vector<128x128xbf16>, vector<8x128xf32> -> vector<8x128xf32>
    %12 = vector.extract_strided_slice %7 {offsets = [0, 0], sizes = [1, 128], strides = [1, 1]} : vector<2x128xf32> to vector<1x128xf32>
    %13 = vector.broadcast %12 : vector<1x128xf32> to vector<8x128xf32>
    %14 = arith.addf %11, %13 : vector<8x128xf32>
    %cst_11 = arith.constant 0.000000e+00 : f32
    %15 = vector.broadcast %cst_11 : f32 to vector<8x128xf32>
    %16 = arith.cmpf oge, %14, %15 : vector<8x128xf32>
    %cst_12 = arith.constant 0.00999999977 : f32
    %17 = vector.broadcast %cst_12 : f32 to vector<8x128xf32>
    %18 = arith.mulf %17, %14 : vector<8x128xf32>
    %19 = arith.select %16, %14, %18 : vector<8x128xi1>, vector<8x128xf32>
    %20 = arith.truncf %19 : vector<8x128xf32> to vector<8x128xbf16>
    %cst_13 = arith.constant dense<0.000000e+00> : vector<8x128xf32>
    %21 = tpu.matmul %20, %9, %cst_13 {dimension_numbers = #tpu.dot_dimension_numbers<[1], [0], [0], [1], [0, 0, 1, 1], [], []>} : vector<8x128xbf16>, vector<128x128xbf16>, vector<8x128xf32> -> vector<8x128xf32>
    %22 = vector.extract_strided_slice %7 {offsets = [1, 0], sizes = [1, 128], strides = [1, 1]} : vector<2x128xf32> to vector<1x128xf32>
    %23 = vector.broadcast %22 : vector<1x128xf32> to vector<8x128xf32>
    %24 = arith.addf %21, %23 : vector<8x128xf32>
    %c0_14 = arith.constant 0 : index
    %c0_15 = arith.constant 0 : index
    %25 = vector.load %arg4[%c0_14, %c0_15] : memref<8x128xf32, #tpu.memory_space<vmem>>, vector<8x128xf32>
    tpu.vector_store %arg4[%c0_14, %c0_15], %24 {strides = array<i32>} : memref<8x128xf32, #tpu.memory_space<vmem>>, vector<8x128xf32>,
    return
  }
}

</mosaic_0001>

<bundles_post_ra>
// kernel: e2e_forward.1
= control target key start
LH: loop header
LB: loop body
LE: loop exit
PB: predicated region body
PF: predicated region fallthrough
CT: control target
= control target key end

     0   :  { %vm122_vm0 = vcmask 785408   ;;  %vm326_vm1 = vcmask 1041409   ;;  %vm328_vm2 = vcmask 1042434   ;;  %vm330_vm3 = vcmask 1043459   ;;  %s765_s1 = inlined_call_operand.vmem [shape: bf16[96,128], index: 1, kind: input, shape index: {}]   ;;  %s766_s0 = inlined_call_operand.vmem [shape: bf16[128,96], index: 0, kind: input, shape index: {}]   ;;  %s767_s2 = inlined_call_operand.vmem [shape: bf16[256,128], index: 2, kind: input, shape index: {}]   ;;  %s768_s3 = inlined_call_operand.vmem [shape: f32[2,128], index: 3, kind: input, shape index: {}]   ;;  %s769_s4 = inlined_call_operand.vmem [shape: f32[8,128], index: 4, kind: output, shape index: {}]  }
   0x1   :  { %v615_v0 = vld [vmem:[%s765_s1 + $0x28] sm:$0xff]  ;;  %v614_v1 = vld [vmem:[%s765_s1 + $0x20] sm:$0xff]  ;;  %v613_v2 = vld [vmem:[%s765_s1 + $0x18] sm:$0xff]  ;;  %vm332_vm4 = vcmask 1044484   ;;  %vm334_vm5 = vcmask 1045509   ;;  %vm336_vm6 = vcmask 1046534  }
   0x2   :  { %149 = vmatpush.bf16.msra.mxu0 %v615_v0  ;;  %633 = vmatpush.bf16.msra.mxu3 %v615_v0  ;;  %v612_v3 = vld [vmem:[%s765_s1 + $0x10] sm:$0xff]  ;;  %v611_v4 = vld [vmem:[%s765_s1 + $0x8] sm:$0xff]  ;;  %v610_v5 = vld [vmem:[%s765_s1] sm:$0xff]  ;;  %vm338_vm7 = vcmask 1047559  }
   0x3   :  { %632 = vmatpush.bf16.msra.mxu1 %v615_v0  ;;  %v602_v6 = vld [vmem:[%s766_s0] sm:$0xff]  ;;  %v607_v7 = vld [vmem:[%s766_s0 + $0x28] sm:$0xff]  ;;  %v605_v8 = vld [vmem:[%s766_s0 + $0x18] sm:$0xff] }
   0x4   :  { %v603_v9 = vld [vmem:[%s766_s0 + $0x8] sm:$0xff]  ;;  %v608_v10 = vld [vmem:[%s766_s0 + $0x30] sm:$0xff]  ;;  %v606_v11 = vld [vmem:[%s766_s0 + $0x20] sm:$0xff] }
   0x5   :  { %v604_v12 = vld [vmem:[%s766_s0 + $0x10] sm:$0xff]  ;;  %v609_v13 = vld [vmem:[%s766_s0 + $0x38] sm:$0xff]  ;;  %v621_v21 = vld [vmem:[%s767_s2 + $0x28] sm:$0xff] }
   0x6   :  { %150 = vmatpush.bf16.msra.mxu0 %v614_v1  ;;  %635 = vmatpush.bf16.msra.mxu3 %v614_v1  ;;  %v623_v16 = vld [vmem:[%s767_s2 + $0x38] sm:$0xff]  ;;  %v622_v20 = vld [vmem:[%s767_s2 + $0x30] sm:$0xff]  ;;  %v620_v25 = vld [vmem:[%s767_s2 + $0x20] sm:$0xff] }
   0x7   :  { %634 = vmatpush.bf16.msra.mxu1 %v614_v1  ;;  %v619_v26 = vld [vmem:[%s767_s2 + $0x18] sm:$0xff]  ;;  %v618_v37 = vld [vmem:[%s767_s2 + $0x10] sm:$0xff]  ;;  %v617_v46 = vld [vmem:[%s767_s2 + $0x8] sm:$0xff] }
   0x8   :  { %v616_v52 = vld [vmem:[%s767_s2] sm:$0xff] }
   0xa   :  { %151 = vmatpush.bf16.msra.mxu0 %v613_v2  ;;  %637 = vmatpush.bf16.msra.mxu3 %v613_v2 }
   0xb   :  { %636 = vmatpush.bf16.msra.mxu1 %v613_v2 }
   0xe   :  { %152 = vmatpush.bf16.msra.mxu0 %v612_v3  ;;  %639 = vmatpush.bf16.msra.mxu3 %v612_v3 }
   0xf   :  { %638 = vmatpush.bf16.msra.mxu1 %v612_v3  ;;  %v631_v3 = vld [vmem:[%s767_s2 + $0x78] sm:$0xff] }
  0x10   :  { %456 = vmatpush.bf16.msra.mxu2 %v631_v3 }
  0x12   :  { %153 = vmatpush.bf16.msra.mxu0 %v611_v4  ;;  %641 = vmatpush.bf16.msra.mxu3 %v611_v4 }
  0x13   :  { %640 = vmatpush.bf16.msra.mxu1 %v611_v4 }
  0x16   :  { %154 = vmatpush.bf16.msra.mxu0 %v610_v5  ;;  %643 = vmatpush.bf16.msra.mxu3 %v610_v5 }
  0x17   :  { %642 = vmatpush.bf16.msra.mxu1 %v610_v5 }
  0x19   :  { %530 = vmatmul.msk.bf16.vlgmr.msra.gmra.mxu0 %vm122_vm0, %v602_v6  ;;  %535 = vmatmul.msk.bf16.vlgmr.msra.gmra.mxu3 %vm122_vm0, %v607_v7 }
  0x1a   :  { %533 = vmatmul.msk.bf16.vlgmr.msra.gmra.mxu1 %vm122_vm0, %v605_v8  ;;  %v630_v8 = vld [vmem:[%s767_s2 + $0x70] sm:$0xff] }
  0x1b   :  { %390 = vmatpush.bf16.msrb.mxu1 %v623_v16  ;;  %457 = vmatpush.bf16.msra.mxu2 %v630_v8 }
  0x1f   :  { %391 = vmatpush.bf16.msrb.mxu1 %v622_v20 }
  0x23   :  { %392 = vmatpush.bf16.msrb.mxu1 %v621_v21 }
  0x27   :  { %393 = vmatpush.bf16.msrb.mxu1 %v620_v25 }
  0x29   :  { %531 = vmatmul.msk.bf16.gmra.mxu0 %vm122_vm0, %v603_v9  ;;  %536 = vmatmul.msk.bf16.gmra.mxu3 %vm122_vm0, %v608_v10 }
  0x2a   :  { %534 = vmatmul.msk.bf16.gmra.mxu1 %vm122_vm0, %v606_v11 }
  0x2b   :  { %394 = vmatpush.bf16.msrb.mxu1 %v619_v26 }
  0x2f   :  { %395 = vmatpush.bf16.msrb.mxu1 %v618_v37 }
  0x33   :  { %396 = vmatpush.bf16.msrb.mxu1 %v617_v46 }
  0x37   :  { %397 = vmatpush.bf16.msrb.mxu1 %v616_v52  ;;  %v626_v52 = vld [vmem:[%s767_s2 + $0x50] sm:$0xff] }
  0x39   :  { %532 = vmatmul.msk.bf16.gmra.mxu0 %vm122_vm0, %v604_v12  ;;  %537 = vmatmul.msk.bf16.gmra.mxu3 %vm122_vm0, %v609_v13 }
  0x96   :  { %v156_v14 = vpop.f32.mrf.mxu0 }
  0x97   :  { %v171_v15 = vpop.f32.mrf.mxu1  ;;  %v196_v29 = vmax.f32 %v156_v14, 0.0 }
  0x98   :  { %v202_v30 = vmax.f32 %v171_v15, 0.0 }
  0x9c   :  { %v181_v17 = vpop.f32.mrf.mxu3 }
  0x9d   :  { %v206_v42 = vmax.f32 %v181_v17, 0.0 }
  0x9e   :  { %v158_v18 = vpop.f32.mrf.mxu0 }
  0x9f   :  { %v173_v19 = vpop.f32.mrf.mxu1  ;;  %v197_v27 = vmax.f32 %v158_v18, 0.0  ;;  %v629_v18 = vld [vmem:[%s767_s2 + $0x68] sm:$0xff] }
  0xa0   :  { %v203_v31 = vmax.f32 %v173_v19, 0.0  ;;  %458 = vmatpush.bf16.msra.mxu2 %v629_v18 }
  0xa1   :  { %v212_v38 = vadd.f32 %v197_v27, %v196_v29 }
  0xa2   :  { %v233_v43 = vadd.f32 %v203_v31, %v202_v30  ;;  %v628_v30 = vld [vmem:[%s767_s2 + $0x60] sm:$0xff] }
  0xa3   :  { %v213_v47 = vrot.slane %v212_v38, 4 }
  0xa4   :  { %v183_v22 = vpop.f32.mrf.mxu3  ;;  %v234_v53 = vrot.slane %v233_v43, 4  ;;  %459 = vmatpush.bf16.msra.mxu2 %v628_v30 }
  0xa5   :  { %v207_v39 = vmax.f32 %v183_v22, 0.0  ;;  %v214_v58 = vadd.f32 %v213_v47, %v212_v38 }
  0xa6   :  { %v161_v23 = vpop.f32.mrf.mxu0  ;;  %v235_v61 = vadd.f32 %v234_v53, %v233_v43 }
  0xa7   :  { %v176_v24 = vpop.f32.mrf.mxu1  ;;  %v198_v33 = vmax.f32 %v161_v23, 0.0  ;;  %v247_v48 = vadd.f32 %v207_v39, %v206_v42  ;;  %v215_v0 = vrot.slane %v214_v58, 2 }
  0xa8   :  { %v204_v34 = vmax.f32 %v176_v24, 0.0  ;;  %v236_v5 = vrot.slane %v235_v61, 2 }
  0xa9   :  { %v248_v59 = vrot.slane %v247_v48, 4  ;;  %v216_v12 = vadd.f32 %v215_v0, %v214_v58 }
  0xaa   :  { %v237_v16 = vadd.f32 %v236_v5, %v235_v61 }
  0xab   :  { %v249_v1 = vadd.f32 %v248_v59, %v247_v48  ;;  %v217_v21 = vrot.slane %v216_v12, 1 }
  0xac   :  { %v186_v28 = vpop.f32.mrf.mxu3 }
  0xad   :  { %v208_v50 = vmax.f32 %v186_v28, 0.0  ;;  %v250_v13 = vrot.slane %v249_v1, 2  ;;  %v238_v28 = vrot.slane %v237_v16, 1 }
  0xae   :  { %v163_v32 = vpop.f32.mrf.mxu0 }
  0xaf   :  { %v199_v35 = vmax.f32 %v163_v32, 0.0  ;;  %v178_v36 = vpop.f32.mrf.mxu1  ;;  %v251_v22 = vadd.f32 %v250_v13, %v249_v1  ;;  %v239_v39 = vadd.f32 %v238_v28, %v237_v16  ;;  %v624_v13 = vld [vmem:[%s767_s2 + $0x40] sm:$0xff] }
  0xb0   :  { %v205_v40 = vmax.f32 %v178_v36, 0.0 }
  0xb1   :  { %v219_v41 = vadd.f32 %v199_v35, %v198_v33  ;;  %v252_v35 = vrot.slane %v251_v22, 1 }
  0xb2   :  { %v240_v45 = vadd.f32 %v205_v40, %v204_v34  ;;  %v218_v34 = vadd.f32 %v217_v21, %v216_v12  ;;  %v625_v12 = vld [vmem:[%s767_s2 + $0x48] sm:$0xff] }
  0xb3   :  { %v220_v44 = vrot.slane %v219_v41, 4  ;;  %v253_v46 = vadd.f32 %v252_v35, %v251_v22 }
  0xb4   :  { %v188_v49 = vpop.f32.mrf.mxu3  ;;  %v241_v56 = vrot.slane %v240_v45, 4 }
  0xb5   :  { %v209_v51 = vmax.f32 %v188_v49, 0.0  ;;  %v221_v54 = vadd.f32 %v220_v44, %v219_v41  ;;  %v627_v41 = vld [vmem:[%s767_s2 + $0x58] sm:$0xff] }
  0xb6   :  { %v166_v55 = vpop.f32.mrf.mxu0  ;;  %v242_v63 = vadd.f32 %v241_v56, %v240_v45  ;;  %v301_v45 = vpack.c.bf16 %v218_v34, %v218_v34  ;;  %460 = vmatpush.bf16.msra.mxu2 %v627_v41 }
  0xb7   :  { %v254_v57 = vadd.f32 %v209_v51, %v208_v50  ;;  %v222_v62 = vrot.slane %v221_v54, 2  ;;  %v200_v10 = vmax.f32 %v166_v55, 0.0  ;;  %v304_v50 = vpack.c.bf16 %v239_v39, %v239_v39 }
  0xb8   :  { %v243_v9 = vrot.slane %v242_v63, 2  ;;  %v318_v56 = vunpack.c.l.b16 %v301_v45 }
  0xb9   :  { %v255_v60 = vrot.slane %v254_v57, 4  ;;  %v223_v6 = vadd.f32 %v222_v62, %v221_v54  ;;  %v321_v61 = vunpack.c.l.b16 %v304_v50 }
  0xba   :  { %v244_v19 = vadd.f32 %v243_v9, %v242_v63  ;;  %461 = vmatpush.bf16.msra.mxu2 %v626_v52 }
  0xbb   :  { %v256_v4 = vadd.f32 %v255_v60, %v254_v57  ;;  %v224_v17 = vrot.slane %v223_v6, 1  ;;  %v306_v57 = vpack.c.bf16 %v253_v46, %v253_v46 }
  0xbc   :  { %v191_v2 = vpop.f32.mrf.mxu3  ;;  %v245_v31 = vrot.slane %v244_v19, 1 }
  0xbd   :  { %v257_v14 = vrot.slane %v256_v4, 2  ;;  %v210_v25 = vmax.f32 %v191_v2, 0.0  ;;  %v225_v29 = vadd.f32 %v224_v17, %v223_v6  ;;  %v323_v2 = vunpack.c.l.b16 %v306_v57 }
  0xbe   :  { %v168_v7 = vpop.f32.mrf.mxu0  ;;  %v246_v42 = vadd.f32 %v245_v31, %v244_v19  ;;  %462 = vmatpush.bf16.msra.mxu2 %v625_v12 }
  0xbf   :  { %v201_v11 = vmax.f32 %v168_v7, 0.0  ;;  %v258_v24 = vadd.f32 %v257_v14, %v256_v4  ;;  %v302_v40 = vpack.c.bf16 %v225_v29, %v225_v29  ;;  %v268_v14 = vld [vmem:[%s768_s3] sm:$0x3] }
  0xc0   :  { %v305_v53 = vpack.c.bf16 %v246_v42, %v246_v42  ;;  %v407_v22 = vperm.slane %v268_v14, 1 }
  0xc1   :  { %v226_v15 = vadd.f32 %v201_v11, %v200_v10  ;;  %v259_v36 = vrot.slane %v258_v24, 1  ;;  %v319_v51 = vunpack.c.l.b16 %v302_v40 }
  0xc2   :  { %v322_v63 = vunpack.c.l.b16 %v305_v53  ;;  %463 = vmatpush.bf16.msra.mxu2 %v624_v13 }
  0xc3   :  { %v227_v20 = vrot.slane %v226_v15, 4  ;;  %v260_v47 = vadd.f32 %v259_v36, %v258_v24  ;;  %v327_v62 = vsel %vm326_vm1, %v319_v51, %v318_v56 }
  0xc4   :  { %v193_v23 = vpop.f32.mrf.mxu3 }
  0xc5   :  { %v228_v26 = vadd.f32 %v227_v20, %v226_v15  ;;  %v211_v27 = vmax.f32 %v193_v23, 0.0  ;;  %v307_v58 = vpack.c.bf16 %v260_v47, %v260_v47  ;;  %v309_v15 = vperm.slane %v268_v14, 0 }
  0xc7   :  { %v229_v32 = vrot.slane %v228_v26, 2  ;;  %v261_v33 = vadd.f32 %v211_v27, %v210_v25  ;;  %v324_v4 = vunpack.c.l.b16 %v307_v58 }
  0xc9   :  { %v230_v37 = vadd.f32 %v229_v32, %v228_v26  ;;  %v262_v38 = vrot.slane %v261_v33, 4 }
  0xcb   :  { %v231_v43 = vrot.slane %v230_v37, 1  ;;  %v263_v44 = vadd.f32 %v262_v38, %v261_v33 }
  0xcd   :  { %v232_v48 = vadd.f32 %v231_v43, %v230_v37  ;;  %v264_v49 = vrot.slane %v263_v44, 2 }
  0xcf   :  { %v303_v54 = vpack.c.bf16 %v232_v48, %v232_v48  ;;  %v265_v55 = vadd.f32 %v264_v49, %v263_v44 }
  0xd1   :  { %v320_v59 = vunpack.c.l.b16 %v303_v54  ;;  %v266_v60 = vrot.slane %v265_v55, 1 }
  0xd3   :  { %v329_v0 = vsel %vm328_vm2, %v320_v59, %v327_v62  ;;  %v267_v1 = vadd.f32 %v266_v60, %v265_v55 }
  0xd4   :  { %v331_v3 = vsel %vm330_vm3, %v321_v61, %v329_v0 }
  0xd5   :  { %v308_v5 = vpack.c.bf16 %v267_v1, %v267_v1  ;;  %v333_v6 = vsel %vm332_vm4, %v322_v63, %v331_v3 }
  0xd6   :  { %v335_v7 = vsel %vm334_vm5, %v323_v2, %v333_v6 }
  0xd7   :  { %v325_v8 = vunpack.c.l.b16 %v308_v5  ;;  %v337_v9 = vsel %vm336_vm6, %v324_v4, %v335_v7 }
  0xd9   :  { %v339_v10 = vsel %vm338_vm7, %v325_v8, %v337_v9 }
  0xda   :  { %v340_v11 = vpack.c.b16 %v339_v10, %v339_v10 }
  0xdc   :  { %398 = vmatmul.bf16.vlgmr.msrb.gmra.mxu1 %v340_v11 }
 0x159   :  { %v399_v16 = vpop.f32.mrf.mxu1 }
 0x15a   :  { %v400_v17 = vadd.f32 %v399_v16, %v309_v15 }
 0x15c   :  { %v404_v18 = vmul.f32 0.01, %v400_v17  ;;  %vm403_vm8 = vcmp.ge.f32.partialorder %v400_v17, 0.0 }
 0x15e   :  { %v405_v19 = vsel %vm403_vm8, %v400_v17, %v404_v18 }
 0x15f   :  { %v406_v20 = vpack.c.bf16 %v405_v19, %v405_v19 }
 0x161   :  { %v401_v21 = vpop.f32.mrf.mxu1  ;;  %464 = vmatmul.bf16.vlgmr.msra.gmra.mxu2 %v406_v20 }
 0x1e4   :  { %v465_v23 = vpop.f32.mrf.mxu2 }
 0x1e5   :  { %v466_v24 = vadd.f32 %v465_v23, %v407_v22 }
 0x1e7   :  { %469 = vst [vmem:[%s769_s4] sm:$0xff] %v466_v24 }
 0x1ec   :  { %v467_v25 = vpop.f32.mrf.mxu2 }

</bundles_post_ra>
